<compile_context>
chip_gen: v7x
topology: tpu7x:2x2x1
jax: 0.10.0
libtpu: 0.0.40
codegen_flags: <defaults>
</compile_context>

<pallas_src>
import math

import jax
import jax.numpy as jnp
from jax.experimental import pallas as pl
from jax.experimental.pallas import tpu as pltpu

EPS = 1e-5
_K_RESIDENT_MAX = 2048            # K up to this -> single full-K block, 2-D grid
_MIN_VMEM_LIMIT = 16 * 1024 * 1024


def _round_up(v, m):
    return ((v + m - 1) // m) * m


def _vmem_capacity_bytes():
    """Physical VMEM of the current chip; conservative fallback = v7x per-TC."""
    try:
        return int(pltpu.get_tpu_info().vmem_capacity_bytes)
    except Exception:
        return 64 * 1024 * 1024


# ----------------------------------------------------------------------------
# Pallas kernel bodies
# ----------------------------------------------------------------------------


def _linear_bn_silu_kernel(x_ref, w_ref, s_ref, b_ref, o_ref):
    """Full-K-resident path: o = silu((x @ w) * scale + shift) on a 2-D grid."""
    y = jnp.dot(x_ref[...].astype(jnp.bfloat16),
                w_ref[...].astype(jnp.bfloat16),
                preferred_element_type=jnp.float32)
    y = y * s_ref[...] + b_ref[...]
    o_ref[...] = (y * jax.nn.sigmoid(y)).astype(o_ref.dtype)


def _linear_bn_silu_kacc_kernel(x_ref, w_ref, s_ref, b_ref, o_ref):
    """Large-K fallback: accumulate directly into the resident f32 output block
    along the innermost K grid axis; epilogue applied in place on the last step."""
    k = pl.program_id(2)

    @pl.when(k == 0)
    def _():
        o_ref[...] = jnp.zeros_like(o_ref)

    o_ref[...] += jnp.dot(x_ref[...].astype(jnp.bfloat16),
                          w_ref[...].astype(jnp.bfloat16),
                          preferred_element_type=jnp.float32)

    @pl.when(k == pl.num_programs(2) - 1)
    def _():
        y = o_ref[...] * s_ref[...] + b_ref[...]
        o_ref[...] = y * jax.nn.sigmoid(y)


# ----------------------------------------------------------------------------
# Wrapper
# ----------------------------------------------------------------------------


def fused_linear_bn_silu(x, w_t, scale, shift, *, tm=512, tn=512, tk=512):
    """silu((x @ w_t) * scale + shift).

    x: (M, K) f32, w_t: (K, N) f32, scale/shift: (N,) f32  ->  (M, N) f32.
    """
    M, K = x.shape
    K2, N = w_t.shape
    assert K == K2

    # ---- tile selection ------------------------------------------------------
    # N tile: lane-dense. 256-multiples when N >= 256 (v6e/v7x 256x256 MXU),
    # 128-multiples otherwise (v5e-native, smaller padding waste for small N).
    if N > tn:
        TN = tn
    elif N >= 256:
        TN = _round_up(N, 256)
    else:
        TN = _round_up(N, 128)
    Np = _round_up(N, TN)

    # M tile: sublane-aligned (16 covers bf16 packing and f32 tiling).
    TM = tm if M > tm else _round_up(M, 16)
    Mp = _round_up(M, TM)

    # v7x megacore: make sure there are >= 2 parallel output tiles when M allows.
    if (Mp // TM) * (Np // TN) < 2 and M > 16:
        TM = max(16, _round_up(-(-M // 2), 16))
        Mp = _round_up(M, TM)

    grid_m, grid_n = Mp // TM, Np // TN

    # K: keep the whole reduction resident when it fits (no K grid axis at all).
    k_resident = K <= _K_RESIDENT_MAX
    if k_resident:
        TK, Kp = K, K                 # full-dim block: legal, no K padding needed
    else:
        TK = tk                       # 256-multiple for the v6e/v7x MXU
        Kp = _round_up(K, TK)
    grid_k = Kp // TK

    # ---- operand prep: bf16 in the wrapper only when the operand is re-read --
    x_in = x.astype(jnp.bfloat16) if grid_n >= 2 else x
    w_in = w_t.astype(jnp.bfloat16) if grid_m >= 2 else w_t
    if (Mp, Kp) != (M, K):
        x_in = jnp.pad(x_in, ((0, Mp - M), (0, Kp - K)))
    if (Kp, Np) != (K, N):
        w_in = jnp.pad(w_in, ((0, Kp - K), (0, Np - N)))
    s2 = scale.reshape(1, N).astype(jnp.float32)
    b2 = shift.reshape(1, N).astype(jnp.float32)
    if Np != N:
        s2 = jnp.pad(s2, ((0, 0), (0, Np - N)))
        b2 = jnp.pad(b2, ((0, 0), (0, Np - N)))

    # ---- chip-aware VMEM budget (replaces the old hard 32 MiB cap) -----------
    tile_bytes = (2 * TM * TK * x_in.dtype.itemsize      # double-buffered x tiles
                  + 2 * TK * TN * w_in.dtype.itemsize    # double-buffered w tiles
                  + 2 * 2 * TN * 4                       # scale / shift
                  + 2 * TM * TN * 4)                     # f32 output (also the acc)
    vmem_cap = _vmem_capacity_bytes()
    vmem_limit = int(min(max(2 * tile_bytes, _MIN_VMEM_LIMIT), 0.7 * vmem_cap))

    out_shape = jax.ShapeDtypeStruct((Mp, Np), jnp.float32)

    if k_resident:
        grid = (grid_m, grid_n)
        in_specs = [
            pl.BlockSpec((TM, TK), lambda i, j: (i, 0)),   # constant over j: no re-DMA
            pl.BlockSpec((TK, TN), lambda i, j: (0, j)),
            pl.BlockSpec((1, TN), lambda i, j: (0, j)),
            pl.BlockSpec((1, TN), lambda i, j: (0, j)),
        ]
        out_specs = pl.BlockSpec((TM, TN), lambda i, j: (i, j))
        kernel = _linear_bn_silu_kernel
        semantics = ("parallel", "parallel")
    else:
        grid = (grid_m, grid_n, grid_k)
        in_specs = [
            pl.BlockSpec((TM, TK), lambda i, j, k: (i, k)),
            pl.BlockSpec((TK, TN), lambda i, j, k: (k, j)),
            pl.BlockSpec((1, TN), lambda i, j, k: (0, j)),
            pl.BlockSpec((1, TN), lambda i, j, k: (0, j)),
        ]
        out_specs = pl.BlockSpec((TM, TN), lambda i, j, k: (i, j))
        kernel = _linear_bn_silu_kacc_kernel
        semantics = ("parallel", "parallel", "arbitrary")

    out = pl.pallas_call(
        kernel,
        out_shape=out_shape,
        grid_spec=pltpu.PrefetchScalarGridSpec(
            num_scalar_prefetch=0,
            grid=grid,
            in_specs=in_specs,
            out_specs=out_specs,
        ),
        compiler_params=pltpu.CompilerParams(
            dimension_semantics=semantics,
            vmem_limit_bytes=vmem_limit,
        ),
    )(x_in, w_in, s2, b2)

    if (Mp, Np) != (M, N):
        out = out[:M, :N]
    return out


# ----------------------------------------------------------------------------
# Module port (eval mode): BN folded into (scale, shift); Dropout == identity
# ----------------------------------------------------------------------------


class MyLinearBN3D:
    def __init__(self, in_channels, out_channels, key):
        k1, k2, k3, k4, k5, k6 = jax.random.split(key, 6)
        bound = 1.0 / math.sqrt(in_channels)
        # PyTorch nn.Linear layout: weight (Cout, Cin), bias (Cout,)
        self.w = jax.random.uniform(k1, (out_channels, in_channels),
                                    jnp.float32, -bound, bound)
        self.b = jax.random.uniform(k2, (out_channels,), jnp.float32, -bound, bound)
        # Non-trivial eval-mode BN affine/stats so the fold is actually exercised.
        self.gamma = 1.0 + 0.1 * jax.random.normal(k3, (out_channels,), jnp.float32)
        self.beta = 0.1 * jax.random.normal(k4, (out_channels,), jnp.float32)
        self.running_mean = 0.1 * jax.random.normal(k5, (out_channels,), jnp.float32)
        self.running_var = jax.random.uniform(k6, (out_channels,), jnp.float32, 0.5, 1.5)

    def _folded(self):
        s = self.gamma / jnp.sqrt(self.running_var + EPS)
        shift = (self.b - self.running_mean) * s + self.beta
        return self.w.T, s, shift            # (K, N), (N,), (N,)

    def __call__(self, x):
        """x: (B, H, W, Cin) -> (B, H, W, Cout). Linear on last dim; the
        permute/BatchNorm2d/permute pair is exactly a per-channel affine on the
        last dim, which is folded into the kernel epilogue."""
        B, H, W, Cin = x.shape
        w_t, scale, shift = self._folded()
        y = fused_linear_bn_silu(x.reshape(B * H * W, Cin), w_t, scale, shift)
        # TODO(synk): nn.Dropout is identity in eval mode (no train-mode RNG).
        return y.reshape(B, H, W, -1)


def reference_forward(mod, x):
    """Pure-JAX f32 reference of the PyTorch eval-mode forward."""
    y = x @ mod.w.T + mod.b
    y = (y - mod.running_mean) / jnp.sqrt(mod.running_var + EPS) * mod.gamma + mod.beta
    return y * jax.nn.sigmoid(y)


# ----------------------------------------------------------------------------
# Demo
# ----------------------------------------------------------------------------

if __name__ == "__main__":
    B, H, W, CIN, COUT = 2, 16, 16, 32, 64

    key = jax.random.PRNGKey(0)
    k_params, k_x = jax.random.split(key)
    mod = MyLinearBN3D(CIN, COUT, k_params)
    x = jax.random.normal(k_x, (B, H, W, CIN), jnp.float32)

    fwd = jax.jit(mod.__call__)
    out = jax.block_until_ready(fwd(x))

    ref = reference_forward(mod, x)
    assert out.shape == (B, H, W, COUT)
    assert bool(jnp.all(jnp.isfinite(out)))
    max_err = float(jnp.max(jnp.abs(out - ref)))
    assert max_err < 5e-2, f"max abs err {max_err}"   # bf16-matmul tolerance
    print("KERNEL_OK")
</pallas_src>

<mosaic_0001>
module attributes {stable_mosaic.version = 11 : i64} {
  func.func @_linear_bn_silu_kernel(%arg0: i32, %arg1: i32, %arg2: memref<256x32xf32, #tpu.memory_space<vmem>>, %arg3: memref<32x128xbf16, #tpu.memory_space<vmem>>, %arg4: memref<1x128xf32, #tpu.memory_space<vmem>>, %arg5: memref<1x128xf32, #tpu.memory_space<vmem>>, %arg6: memref<256x128xf32, #tpu.memory_space<vmem>>) attributes {dimension_semantics = [#tpu.dimension_semantics<parallel>, #tpu.dimension_semantics<parallel>], iteration_bounds = array<i64: 2, 1>, scalar_prefetch = 0 : i64, scratch_operands = 0 : i64, tpu.core_type = #tpu.core_type<tc>, window_params = [{transform_indices = @transform_0, window_bounds = array<i64: 256, 32>}, {transform_indices = @transform_1, window_bounds = array<i64: 32, 128>}, {transform_indices = @transform_2, window_bounds = array<i64: 1, 128>}, {transform_indices = @transform_3, window_bounds = array<i64: 1, 128>}, {transform_indices = @transform_4, window_bounds = array<i64: 256, 128>}]} {
    %c0 = arith.constant 0 : index
    %c0_0 = arith.constant 0 : index
    %0 = vector.load %arg2[%c0, %c0_0] : memref<256x32xf32, #tpu.memory_space<vmem>>, vector<256x32xf32>
    %1 = arith.truncf %0 : vector<256x32xf32> to vector<256x32xbf16>
    %c0_1 = arith.constant 0 : index
    %c0_2 = arith.constant 0 : index
    %2 = vector.load %arg3[%c0_1, %c0_2] : memref<32x128xbf16, #tpu.memory_space<vmem>>, vector<32x128xbf16>
    %cst = arith.constant dense<0.000000e+00> : vector<256x128xf32>
    %3 = tpu.matmul %1, %2, %cst {dimension_numbers = #tpu.dot_dimension_numbers<[1], [0], [0], [1], [0, 0, 1, 1], [], []>} : vector<256x32xbf16>, vector<32x128xbf16>, vector<256x128xf32> -> vector<256x128xf32>
    %c0_3 = arith.constant 0 : index
    %c0_4 = arith.constant 0 : index
    %4 = vector.load %arg4[%c0_3, %c0_4] : memref<1x128xf32, #tpu.memory_space<vmem>>, vector<1x128xf32>
    %5 = vector.broadcast %4 : vector<1x128xf32> to vector<256x128xf32>
    %6 = arith.mulf %3, %5 : vector<256x128xf32>
    %c0_5 = arith.constant 0 : index
    %c0_6 = arith.constant 0 : index
    %7 = vector.load %arg5[%c0_5, %c0_6] : memref<1x128xf32, #tpu.memory_space<vmem>>, vector<1x128xf32>
    %8 = vector.broadcast %7 : vector<1x128xf32> to vector<256x128xf32>
    %9 = arith.addf %6, %8 : vector<256x128xf32>
    %10 = arith.negf %9 : vector<256x128xf32>
    %11 = math.exp %10 : vector<256x128xf32>
    %cst_7 = arith.constant 1.000000e+00 : f32
    %12 = vector.broadcast %cst_7 : f32 to vector<256x128xf32>
    %13 = arith.addf %12, %11 : vector<256x128xf32>
    %14 = arith.divf %12, %13 : vector<256x128xf32>
    %15 = arith.mulf %9, %14 : vector<256x128xf32>
    %c0_8 = arith.constant 0 : index
    %c0_9 = arith.constant 0 : index
    %16 = vector.load %arg6[%c0_8, %c0_9] : memref<256x128xf32, #tpu.memory_space<vmem>>, vector<256x128xf32>
    tpu.vector_store %arg6[%c0_8, %c0_9], %15 {strides = array<i32>} : memref<256x128xf32, #tpu.memory_space<vmem>>, vector<256x128xf32>,
    return
  }
  func.func @transform_0(%arg0: i32, %arg1: i32) -> (i32, i32) {
    %c0_i32 = arith.constant 0 : i32
    %c0_i32_0 = arith.constant 0 : i32
    return %arg0, %c0_i32 : i32, i32
  }
  func.func @transform_1(%arg0: i32, %arg1: i32) -> (i32, i32) {
    %c0_i32 = arith.constant 0 : i32
    %c0_i32_0 = arith.constant 0 : i32
    return %c0_i32, %arg1 : i32, i32
  }
  func.func @transform_2(%arg0: i32, %arg1: i32) -> (i32, i32) {
    %c0_i32 = arith.constant 0 : i32
    %c0_i32_0 = arith.constant 0 : i32
    return %c0_i32, %arg1 : i32, i32
  }
  func.func @transform_3(%arg0: i32, %arg1: i32) -> (i32, i32) {
    %c0_i32 = arith.constant 0 : i32
    %c0_i32_0 = arith.constant 0 : i32
    return %c0_i32, %arg1 : i32, i32
  }
  func.func @transform_4(%arg0: i32, %arg1: i32) -> (i32, i32) {
    %c0_i32 = arith.constant 0 : i32
    return %arg0, %arg1 : i32, i32
  }
}

</mosaic_0001>

<bundles_post_ra>
// kernel: a_call__.1
= control target key start
LH: loop header
LB: loop body
LE: loop exit
PB: predicated region body
PF: predicated region fallthrough
CT: control target
= control target key end

     0   :  { %9 = vsyncpa [#allocation3], 0  ;;  %s1984_s0 = inlined_call_operand.hbm [shape: f32[512,32], index: 0, kind: input, shape index: {}]   ;;  %s1985_s1 = inlined_call_operand.vmem [shape: bf16[32,128], index: 1, kind: input, shape index: {}]   ;;  %s1986_s2 = inlined_call_operand.vmem [shape: f32[1,128], index: 2, kind: input, shape index: {}]   ;;  %s1987_s3 = inlined_call_operand.vmem [shape: f32[1,128], index: 3, kind: input, shape index: {}]   ;;  %s1988_s4 = inlined_call_operand.hbm [shape: f32[512,128], index: 4, kind: output, shape index: {}]  }
   0x1   :  { %11 = vsyncpa [#allocation3 + $0x1], 0 }
   0x2   :  { %12 = vsyncpa [#allocation4], 0 }
   0x3   :  { %14 = vsyncpa [#allocation4 + $0x1], 0  ;;  %s1494_s15 = smov 0   ;;  %s1496_s16 = smov 0  }
   0x4   :  { %s1498_s17 = smov 0   ;;  %s1500_s18 = smov 0  }
   0x5   :  { %s1502_s19 = smov 0   ;;  %s1504_s20 = smov 0  }
   0x6 LB: > { %s1023_s21 = sadd.s32 4294967295, %s1461_s20   ;;  %s1024_s22 = sadd.s32 4294967294, %s1461_s20   ;;  %s1461_s20 = sphi %s1504_s20, %s20_s20   ;;  %s1457_s19 = sphi %s1502_s19, %s2003_s19   ;;  %s1453_s18 = sphi %s1500_s18, %s2002_s18   ;;  %s1449_s17 = sphi %s1498_s17, %s2001_s17   ;;  %s1445_s16 = sphi %s1496_s16, %s2000_s16   ;;  %s1441_s15 = sphi %s1494_s15, %s1999_s15  }
   0x7   : > { %s32_s23 = sadd.s32 1, %s1457_s19  ;;  %s39_s24 = sadd.s32 1, %s1449_s17 }
   0x8   : > { %p34_p0 = scmp.ge.s32.totalorder %s32_s23, 2  ;;  %p46_p1 = scmp.ne.s32.totalorder %s1449_s17, %s1445_s16 }
   0x9   : > { %p47_p2 = scmp.eq.s32.totalorder %s1461_s20, 0  ;;  %p52_p3 = scmp.ne.s32.totalorder %s1445_s16, %s1441_s15 }
   0xa   : > { %s2005_s23 = smov (%p34_p0, %s32_s23), 0  ;;  %p53_p5 = scmp.eq.s32.totalorder %s1023_s21, 0 }
   0xb   : > { %p1535_p4 = por %p47_p2, %p46_p1  ;;  %s36_s26 = ssub.s32 %s1457_s19, %s2005_s23 }
   0xc   : > { %p156_p6 = scmp.eq.s32.totalorder %s1023_s21, 1  ;;  %p37_p7 = scmp.eq.s32.totalorder %s36_s26, 0 }
   0xd   : > { %p1541_p8 = por %p53_p5, %p52_p3  ;;  %p162_p10 = scmp.eq.s32.totalorder %s1024_s22, 1 }
   0xe   : > { %p1545_p9 = por %p156_p6, %p46_p1  ;;  %p1165_p13 = scmp.lt.s32.totalorder %s1461_s20, 2 }
   0xf   : > { %s1550_s29 = scalar_select %p37_p7, %s1449_s17, %s39_s24  }
  0x10   : > { %s1992_s28 = scalar_select %p1545_p9, 1, 0 }
  0x11   : > { %p1552_p11 = por %p162_p10, %p52_p3  ;;  %s201_s5 = sand.u32 1, %s1449_s17  }
  0x12   : > { %s1030_s6 = sshll.u32 %s201_s5, 8  ;;  %s1093_s7 = sshll.u32 %s1457_s19, 12 }
  0x13   : > { %s1993_s30 = scalar_select %p1552_p11, 1, 0 }
  0x14   : > { %s1563_s10 = scalar_lea.hbm %s1984_s0, %s1093_s7  ;;  %s205_s11 = scalar_lea.vmem [#allocation2], %s1030_s6 }
  0x15   : > { %s212_s12 = sshll.u32 %s205_s11, 4  ;;  %p1569_p0 = pnand %p1165_p13, %p1535_p4  ;;  %s1565_s12 = int_to_ptr.vmem [resolvable:$true] %s212_s12 }
  0x16   : > { %s1574_s14 = scalar_lea.sflag [#allocation3], %s201_s5  ;;  %s1349_s21 = scalar_lea.hbm %s1563_s10, 4096 }
  0x17   : > { %p1350_p2 = scmp.ne.s32.totalorder %s1563_s10, %s1349_s21  ;;  %p1351_p3 = pneg %p1569_p0 }
  0x18   : > { %s1354_s25 = scalar_lea.hbm %s1984_s0, 8192  ;;  %p1355_p4 = scmp.lt.u32.totalorder %s1563_s10, %s1984_s0 }
  0x19   : > { %p1352_p5 = pnand %p1351_p3, %p1350_p2  ;;  %p1356_p7 = scmp.lt.u32.totalorder %s1354_s25, %s1349_s21 }
  0x1a   : > { %p1358_p13 = scmp.lt.u32.totalorder %s1349_s21, %s1563_s10 }
  0x1b   : > { %p1353_p6 = pneg %p1352_p5  ;;  %p1357_p10 = por %p1356_p7, %p1355_p4 }
  0x1d   : > { %p1359_p12 = por %p1358_p13, %p1357_p10 }
  0x1f   : > { %p1360_p1 = pnand %p1359_p12, %p1353_p6 }
  0x21   : > { %1363 = shalt.err (!%p1360_p1)
}
  0x22   : > { %s1364_s5 = scalar_lea.vmem %s1565_s12, 4096  ;;  %s1463_s7 = smov [#allocation2]  }
  0x23   : > { %p1365_p2 = scmp.ne.s32.totalorder %s1565_s12, %s1364_s5  ;;  %s1369_s8 = sshll.u32 %s1463_s7, 4  ;;  %s1370_s8 = int_to_ptr.vmem [resolvable:$false] %s1369_s8 }
  0x24   : > { %s1371_s9 = scalar_lea.vmem %s1370_s8, 8192  ;;  %p1372_p9 = scmp.lt.s32.totalorder %s1565_s12, %s1370_s8 }
  0x25   : > { %p1367_p5 = pnand %p1365_p2, %p1351_p3  ;;  %p1373_p4 = scmp.lt.s32.totalorder %s1371_s9, %s1364_s5 }
  0x27   : > { %p1368_p11 = pneg %p1367_p5  ;;  %p1374_p7 = por %p1373_p4, %p1372_p9 }
  0x29   : > { %p1375_p10 = pnand %p1374_p7, %p1368_p11 }
  0x2b   : > { %1378 = shalt.err (!%p1375_p10)
}
  0x2c   : > { %s1464_s11 = smov 128   ;;  %s1465_s21 = smov 8  }
  0x2d   : > { %1160 = dma.hbm_to_vmem [thread:$0]  (!%p1569_p0), %s1563_s10, 4096, %s1565_s12, %s1574_s14, %s1464_s11, %s1464_s11, %s1465_s21  }
  0x2e   : > { %p220_p12 = scmp.lt.s32.totalorder %s1461_s20, 3  ;;  %p1995_p1 = scmp.ge.s32.totalorder %s1461_s20, 1 }
  0x30   : > { %p221_p3 = pnand %p1995_p1, %p220_p12 }
  0x31   : > { %s1606_s22 = sand.u32 (!%p221_p3), 1, %s1445_s16  }
  0x32   : > { %224 = sbr.rel (%p221_p3) target bundleno = 385 (0x181), region = 36  ;;  %s1034_s24 = sshll.u32 (!%p221_p3), %s1606_s22, 8 }
  0x33   : > { %s227_s25 = scalar_lea.sflag (!%p221_p3), [#allocation3], %s1606_s22  ;;  %s1612_s26 = scalar_lea.vmem (!%p221_p3), [#allocation2], %s1034_s24 }
  0x39   : > { %1432 = dma.done.wait (%p1541_p8), %s227_s25, 4096  }
  0x3a   : > { %1434 = vsyncadd (%p1541_p8), %s227_s25, 4294963200  ;;  %v1219_v0 = vld [vmem:[%s1985_s1] sm:$0xff]   ;;  %v1220_v1 = vld [vmem:[%s1985_s1 + $0x8] sm:$0xff]   ;;  %vm342_vm0 = vcmask 261120   ;;  %s1804_s8 = scalar_lea.vmem [#allocation5], %s1034_s24  ;;  %s1094_s9 = sshll.u32 %s1453_s18, 12 }
  0x3b   : > { %1113 = vmatprep.subr.bf16.mxu0 %v1219_v0  ;;  %1149 = vmatprep.subr.bf16.mxu1 %v1219_v0  ;;  %v278_v2 = vld [vmem:[%s1612_s26] sm:$0xff]  ;;  %v279_v3 = vld [vmem:[%s1612_s26 + $0x8] sm:$0xff]  ;;  %v280_v7 = vld [vmem:[%s1612_s26 + $0x10] sm:$0xff]  ;;  %s901_s11 = sshll.u32 %s1804_s8, 4  ;;  %s1929_s18 = scalar_lea.hbm %s1988_s4, %s1094_s9  ;;  %s1931_s11 = int_to_ptr.vmem [resolvable:$true] %s901_s11 }
  0x3c   : > { %v294_v4 = vld [vmem:[%s1612_s26 + $0x80] sm:$0xff]  ;;  %1114 = vmatpush3.bf16.msra.mxu0 %v1219_v0  ;;  %1151 = vmatpush3.bf16.msra.mxu1 %v1219_v0  ;;  %v310_v5 = vpack.c.bf16 %v279_v3, %v278_v2  ;;  %v295_v6 = vld [vmem:[%s1612_s26 + $0x88] sm:$0xff]  ;;  %v281_v8 = vld [vmem:[%s1612_s26 + $0x18] sm:$0xff]  ;;  %s887_s25 = scalar_lea.sflag [#allocation4], %s1606_s22  ;;  %p1996_p9 = scmp.ne.s32.totalorder %s1992_s28, 0 }
  0x3d   : > { %1115 = vmatprep.subr.bf16.mxu0 %v1220_v1  ;;  %1150 = vmatprep.subr.bf16.mxu1 %v1220_v1  ;;  %v318_v9 = vpack.c.bf16 %v295_v6, %v294_v4  ;;  %v296_v10 = vld [vmem:[%s1612_s26 + $0x90] sm:$0xff]  ;;  %v297_v11 = vld [vmem:[%s1612_s26 + $0x98] sm:$0xff]  ;;  %v282_v12 = vld [vmem:[%s1612_s26 + $0x20] sm:$0xff]  ;;  %v311_v16 = vpack.c.bf16 %v281_v8, %v280_v7  ;;  %s1466_s10 = smov [#allocation5]  }
  0x3e   : > { %1117 = vmatprep.mubr.msk.bf16.mxu0 %vm342_vm0, %v310_v5  ;;  %v283_v13 = vld [vmem:[%s1612_s26 + $0x28] sm:$0xff]  ;;  %v298_v14 = vld [vmem:[%s1612_s26 + $0xa0] sm:$0xff]  ;;  %v319_v17 = vpack.c.bf16 %v297_v11, %v296_v10  ;;  %v284_v20 = vld [vmem:[%s1612_s26 + $0x30] sm:$0xff]  ;;  %s1383_s12 = sshll.u32 %s1466_s10, 4  ;;  %s1384_s12 = int_to_ptr.vmem [resolvable:$false] %s1383_s12 }
  0x3f   : > { %v299_v15 = vld [vmem:[%s1612_s26 + $0xa8] sm:$0xff]  ;;  %1133 = vmatprep.mubr.msk.bf16.mxu1 %vm342_vm0, %v318_v9  ;;  %v312_v18 = vpack.c.bf16 %v283_v13, %v282_v12  ;;  %v285_v21 = vld [vmem:[%s1612_s26 + $0x38] sm:$0xff]  ;;  %v300_v22 = vld [vmem:[%s1612_s26 + $0xb0] sm:$0xff]  ;;  %s1385_s13 = scalar_lea.vmem %s1384_s12, 8192  ;;  %p1386_p6 = scmp.lt.s32.totalorder %s1931_s11, %s1384_s12 }
  0x40   : > { %1116 = vmatpush3.bf16.msra.mxu0 %v1220_v1  ;;  %1152 = vmatpush3.bf16.msra.mxu1 %v1220_v1  ;;  %v320_v19 = vpack.c.bf16 %v299_v15, %v298_v14  ;;  %v301_v23 = vld [vmem:[%s1612_s26 + $0xb8] sm:$0xff]  ;;  %v286_v24 = vld [vmem:[%s1612_s26 + $0x40] sm:$0xff]  ;;  %v287_v25 = vld [vmem:[%s1612_s26 + $0x48] sm:$0xff]  ;;  %v313_v28 = vpack.c.bf16 %v285_v21, %v284_v20 }
  0x41   : > { %v302_v26 = vld [vmem:[%s1612_s26 + $0xc0] sm:$0xff]  ;;  %v303_v27 = vld [vmem:[%s1612_s26 + $0xc8] sm:$0xff]  ;;  %v321_v29 = vpack.c.bf16 %v301_v23, %v300_v22  ;;  %v314_v30 = vpack.c.bf16 %v287_v25, %v286_v24  ;;  %v288_v32 = vld [vmem:[%s1612_s26 + $0x50] sm:$0xff] }
  0x42   : > { %v322_v31 = vpack.c.bf16 %v303_v27, %v302_v26  ;;  %v289_v33 = vld [vmem:[%s1612_s26 + $0x58] sm:$0xff]  ;;  %v304_v34 = vld [vmem:[%s1612_s26 + $0xd0] sm:$0xff]  ;;  %v290_v36 = vld [vmem:[%s1612_s26 + $0x60] sm:$0xff] }
  0x43   : > { %1118 = vmatmul.mubr.msk.bf16.vlgmr.msra.gmra.mrb[0].mxu0 %vm342_vm0, %v311_v16  ;;  %1134 = vmatmul.mubr.msk.bf16.vlgmr.msra.gmra.mrb[0].mxu1 %vm342_vm0, %v319_v17  ;;  %v305_v35 = vld [vmem:[%s1612_s26 + $0xd8] sm:$0xff]  ;;  %v291_v37 = vld [vmem:[%s1612_s26 + $0x68] sm:$0xff]  ;;  %v306_v38 = vld [vmem:[%s1612_s26 + $0xe0] sm:$0xff]  ;;  %v315_v40 = vpack.c.bf16 %v289_v33, %v288_v32 }
  0x44   : > { %1121 = vmatprep.mubr.msk.bf16.mxu0 %vm342_vm0, %v312_v18  ;;  %1137 = vmatprep.mubr.msk.bf16.mxu1 %vm342_vm0, %v320_v19  ;;  %v307_v39 = vld [vmem:[%s1612_s26 + $0xe8] sm:$0xff]  ;;  %v323_v41 = vpack.c.bf16 %v305_v35, %v304_v34  ;;  %v316_v42 = vpack.c.bf16 %v291_v37, %v290_v36  ;;  %v292_v44 = vld [vmem:[%s1612_s26 + $0x70] sm:$0xff]  ;;  %v293_v45 = vld [vmem:[%s1612_s26 + $0x78] sm:$0xff] }
  0x45   : > { %v324_v43 = vpack.c.bf16 %v307_v39, %v306_v38  ;;  %v308_v46 = vld [vmem:[%s1612_s26 + $0xf0] sm:$0xff]  ;;  %v309_v47 = vld [vmem:[%s1612_s26 + $0xf8] sm:$0xff]  ;;  %v317_v48 = vpack.c.bf16 %v293_v45, %v292_v44  ;;  %v1675_v50 = vld [vmem:[%s1986_s2] ss:$0 sm:$0xff]  ;;  %s1379_s26 = scalar_lea.vmem %s1931_s11, 4096 }
  0x46   : > { %v325_v49 = vpack.c.bf16 %v309_v47, %v308_v46  ;;  %v1680_v52 = vld [vmem:[%s1987_s3] ss:$0 sm:$0xff]  ;;  %p1380_p8 = scmp.ne.s32.totalorder %s1931_s11, %s1379_s26  ;;  %p1387_p13 = scmp.lt.s32.totalorder %s1385_s13, %s1379_s26 }
  0x48   : > { %p1381_p11 = pnand %p1380_p8, %p1996_p9  ;;  %p1388_p2 = por %p1387_p13, %p1386_p6 }
  0x4a   : > { %p1382_p0 = pneg %p1381_p11 }
  0x4b   : > { %1122 = vmatmul.mubr.msk.bf16.gmra.mrb[4].mxu0 %vm342_vm0, %v313_v28  ;;  %1138 = vmatmul.mubr.msk.bf16.gmra.mrb[4].mxu1 %vm342_vm0, %v321_v29 }
  0x4c   : > { %1125 = vmatprep.mubr.msk.bf16.mxu0 %vm342_vm0, %v314_v30  ;;  %1141 = vmatprep.mubr.msk.bf16.mxu1 %vm342_vm0, %v322_v31  ;;  %p1389_p5 = pnand %p1388_p2, %p1382_p0 }
  0x53   : > { %1126 = vmatmul.mubr.msk.bf16.gmra.mrb[8].mxu0 %vm342_vm0, %v315_v40  ;;  %1142 = vmatmul.mubr.msk.bf16.gmra.mrb[8].mxu1 %vm342_vm0, %v323_v41 }
  0x54   : > { %1129 = vmatprep.mubr.msk.bf16.mxu0 %vm342_vm0, %v316_v42  ;;  %1145 = vmatprep.mubr.msk.bf16.mxu1 %vm342_vm0, %v324_v43 }
  0x5b   : > { %1130 = vmatmul.mubr.msk.bf16.gmra.mrb[12].mxu0 %vm342_vm0, %v317_v48  ;;  %1146 = vmatmul.mubr.msk.bf16.gmra.mrb[12].mxu1 %vm342_vm0, %v325_v49 }
 0x116   : > { %v1119_v51 = vpop.f32.mrb[0].mxu0  ;;  %v1135_v53 = vpop.f32.mrb[0].mxu1 }
 0x117   : > { %v561_v54 = vmul.f32 %v1119_v51, %v1675_v50  ;;  %v577_v55 = vmul.f32 %v1135_v53, %v1675_v50  ;;  %v425_v56 = vpop.f32.mrb[1].mxu0  ;;  %v489_v57 = vpop.f32.mrb[1].mxu1 }
 0x118   : > { %v559_v58 = vmul.f32 %v1675_v50, %v425_v56  ;;  %v575_v59 = vmul.f32 %v1675_v50, %v489_v57  ;;  %v1120_v60 = vpop.f32.mrb[2].mxu0  ;;  %v1136_v61 = vpop.f32.mrb[2].mxu1 }
 0x119   : > { %v1687_v62 = vadd.f32 %v1680_v52, %v561_v54  ;;  %v1690_v63 = vadd.f32 %v1680_v52, %v577_v55  ;;  %v562_v0 = vmul.f32 %v1120_v60, %v1675_v50  ;;  %v578_v1 = vmul.f32 %v1136_v61, %v1675_v50  ;;  %v428_v2 = vpop.f32.mrb[3].mxu0  ;;  %v492_v3 = vpop.f32.mrb[3].mxu1 }
 0x11a   : > { %v1695_v4 = vadd.f32 %v1680_v52, %v559_v58  ;;  %v1698_v5 = vadd.f32 %v1680_v52, %v575_v59  ;;  %v560_v6 = vmul.f32 %v1675_v50, %v428_v2  ;;  %v576_v7 = vmul.f32 %v1675_v50, %v492_v3 }
 0x11b   : > { %v1058_v8 = vmul.f32 -1.442695, %v1687_v62  ;;  %v1074_v9 = vmul.f32 -1.442695, %v1690_v63  ;;  %v1705_v10 = vadd.f32 %v1680_v52, %v562_v0  ;;  %v1708_v11 = vadd.f32 %v1680_v52, %v578_v1 }
 0x11c   : > { %v1056_v12 = vmul.f32 -1.442695, %v1695_v4  ;;  %v1072_v13 = vmul.f32 -1.442695, %v1698_v5  ;;  %v1713_v14 = vadd.f32 %v1680_v52, %v560_v6  ;;  %v1716_v15 = vadd.f32 %v1680_v52, %v576_v7 }
 0x11d   : > { %1221 = vpow2.f32 %v1058_v8  ;;  %v1059_v16 = vmul.f32 -1.442695, %v1705_v10  ;;  %v1075_v17 = vmul.f32 -1.442695, %v1708_v11 }
 0x11e   : > { %1223 = vpow2.f32 %v1074_v9  ;;  %v1123_v18 = vpop.f32.mrb[4].mxu0  ;;  %v1139_v19 = vpop.f32.mrb[4].mxu1  ;;  %v1057_v20 = vmul.f32 -1.442695, %v1713_v14  ;;  %v1073_v25 = vmul.f32 -1.442695, %v1716_v15 }
 0x11f   : > { %1225 = vpow2.f32 %v1056_v12  ;;  %v565_v21 = vmul.f32 %v1123_v18, %v1675_v50  ;;  %v581_v22 = vmul.f32 %v1139_v19, %v1675_v50  ;;  %v441_v23 = vpop.f32.mrb[5].mxu0  ;;  %v505_v24 = vpop.f32.mrb[5].mxu1 }
 0x120   : > { %1227 = vpow2.f32 %v1072_v13  ;;  %v563_v26 = vmul.f32 %v1675_v50, %v441_v23  ;;  %v579_v27 = vmul.f32 %v1675_v50, %v505_v24  ;;  %v1124_v28 = vpop.f32.mrb[6].mxu0  ;;  %v1140_v29 = vpop.f32.mrb[6].mxu1 }
 0x121   : > { %1229 = vpow2.f32 %v1059_v16  ;;  %v1727_v30 = vadd.f32 %v1680_v52, %v565_v21  ;;  %v1730_v31 = vadd.f32 %v1680_v52, %v581_v22  ;;  %v566_v32 = vmul.f32 %v1124_v28, %v1675_v50  ;;  %v444_v33 = vpop.f32.mrb[7].mxu0  ;;  %v508_v34 = vpop.f32.mrb[7].mxu1 }
 0x122   : > { %1231 = vpow2.f32 %v1075_v17  ;;  %v1734_v35 = vadd.f32 %v1680_v52, %v563_v26  ;;  %v1737_v36 = vadd.f32 %v1680_v52, %v579_v27  ;;  %v582_v46 = vmul.f32 %v1140_v29, %v1675_v50 }
 0x123   : > { %1233 = vpow2.f32 %v1057_v20  ;;  %v1062_v37 = vmul.f32 -1.442695, %v1727_v30  ;;  %v1078_v38 = vmul.f32 -1.442695, %v1730_v31  ;;  %v1742_v39 = vadd.f32 %v1680_v52, %v566_v32 }
 0x124   : > { %1235 = vpow2.f32 %v1073_v25  ;;  %v1060_v40 = vmul.f32 -1.442695, %v1734_v35  ;;  %v1076_v41 = vmul.f32 -1.442695, %v1737_v36  ;;  %v564_v53 = vmul.f32 %v1675_v50, %v444_v33 }
 0x125   : > { %1237 = vpow2.f32 %v1062_v37  ;;  %v1063_v42 = vmul.f32 -1.442695, %v1742_v39  ;;  %v580_v58 = vmul.f32 %v1675_v50, %v508_v34  ;;  %v1751_v3 = vadd.f32 %v1680_v52, %v582_v46 }
 0x126   : > { %1239 = vpow2.f32 %v1078_v38  ;;  %v1127_v43 = vpop.f32.mrb[8].mxu0  ;;  %v1143_v44 = vpop.f32.mrb[8].mxu1  ;;  %v1755_v9 = vadd.f32 %v1680_v52, %v564_v53 }
 0x127   : > { %v1222_v45 = vpop.eup %1221  ;;  %1241 = vpow2.f32 %v1060_v40  ;;  %v457_v47 = vpop.f32.mrb[9].mxu0  ;;  %v569_v6 = vmul.f32 %v1127_v43, %v1675_v50  ;;  %v585_v12 = vmul.f32 %v1143_v44, %v1675_v50  ;;  %v1759_v17 = vadd.f32 %v1680_v52, %v580_v58 }
 0x128   : > { %v521_v48 = vpop.f32.mrb[9].mxu1  ;;  %v1224_v49 = vpop.eup %1223  ;;  %v728_v51 = vadd.f32 1.0, %v1222_v45  ;;  %1243 = vpow2.f32 %v1076_v41  ;;  %v567_v20 = vmul.f32 %v1675_v50, %v457_v47  ;;  %v1079_v25 = vmul.f32 -1.442695, %v1751_v3 }
 0x129   : > { %v1128_v54 = vpop.f32.mrb[10].mxu0  ;;  %v1144_v55 = vpop.f32.mrb[10].mxu1  ;;  %v744_v57 = vadd.f32 1.0, %v1224_v49  ;;  %1245 = vpow2.f32 %v1063_v42  ;;  %v1764_v26 = vadd.f32 %v1680_v52, %v569_v6  ;;  %v1061_v33 = vmul.f32 -1.442695, %v1755_v9 }
 0x12a   : > { %v1226_v56 = vpop.eup %1225  ;;  %v460_v59 = vpop.f32.mrb[11].mxu0  ;;  %1247 = vrcp.f32 %v728_v51  ;;  %v1772_v34 = vadd.f32 %v1680_v52, %v585_v12  ;;  %v1077_v42 = vmul.f32 -1.442695, %v1759_v17  ;;  %v583_v43 = vmul.f32 %v1675_v50, %v521_v48 }
 0x12b   : > { %v1228_v60 = vpop.eup %1227  ;;  %v726_v61 = vadd.f32 1.0, %v1226_v56  ;;  %v524_v0 = vpop.f32.mrb[11].mxu1  ;;  %1249 = vrcp.f32 %v744_v57  ;;  %v1785_v49 = vadd.f32 %v1680_v52, %v567_v20  ;;  %v570_v51 = vmul.f32 %v1128_v54, %v1675_v50 }
 0x12c   : > { %v1230_v1 = vpop.eup %1229  ;;  %v742_v2 = vadd.f32 1.0, %v1228_v60  ;;  %v1066_v57 = vmul.f32 -1.442695, %v1764_v26  ;;  %v586_v58 = vmul.f32 %v1144_v55, %v1675_v50  ;;  %v1794_v54 = vadd.f32 %v1680_v52, %v583_v43 }
 0x12d   : > { %v1232_v7 = vpop.eup %1231  ;;  %1251 = vrcp.f32 %v726_v61  ;;  %v729_v8 = vadd.f32 1.0, %v1230_v1  ;;  %v1082_v61 = vmul.f32 -1.442695, %v1772_v34  ;;  %v568_v1 = vmul.f32 %v1675_v50, %v460_v59 }
 0x12e   : > { %v1234_v13 = vpop.eup %1233  ;;  %1253 = vrcp.f32 %v742_v2  ;;  %v745_v16 = vadd.f32 1.0, %v1232_v7  ;;  %v1131_v21 = vpop.f32.mrb[12].mxu0  ;;  %v584_v7 = vmul.f32 %v1675_v50, %v524_v0  ;;  %v1799_v12 = vadd.f32 %v1680_v52, %v570_v51 }
 0x12f   : > { %v1236_v18 = vpop.eup %1235  ;;  %1255 = vrcp.f32 %v729_v8  ;;  %v727_v19 = vadd.f32 1.0, %v1234_v13  ;;  %v1147_v22 = vpop.f32.mrb[12].mxu1  ;;  %v573_v13 = vmul.f32 %v1131_v21, %v1675_v50  ;;  %v1816_v20 = vadd.f32 %v1680_v52, %v568_v1 }
 0x130   : > { %v1238_v23 = vpop.eup %1237  ;;  %1257 = vrcp.f32 %v745_v16  ;;  %v743_v24 = vadd.f32 1.0, %v1236_v18  ;;  %v1766_v27 = vpop.f32.mrb[13].mxu0  ;;  %v589_v59 = vmul.f32 %v1147_v22, %v1675_v50  ;;  %v1822_v22 = vadd.f32 %v1680_v52, %v584_v7 }
 0x131   : > { %v1768_v28 = vpop.f32.mrb[13].mxu1  ;;  %v1240_v29 = vpop.eup %1239  ;;  %1259 = vrcp.f32 %v727_v19  ;;  %v732_v32 = vadd.f32 1.0, %v1238_v23  ;;  %v1064_v19 = vmul.f32 -1.442695, %v1785_v49  ;;  %v1080_v23 = vmul.f32 -1.442695, %v1794_v54 }
 0x132   : > { %v1774_v37 = vpop.f32.mrb[14].mxu0  ;;  %v1776_v38 = vpop.f32.mrb[14].mxu1  ;;  %1261 = vrcp.f32 %v743_v24  ;;  %v748_v41 = vadd.f32 1.0, %v1240_v29  ;;  %v1828_v29 = vadd.f32 %v1680_v52, %v573_v13  ;;  %v587_v13 = vmul.f32 %v1675_v50, %v1768_v28 }
 0x133   : > { %v1242_v40 = vpop.eup %1241  ;;  %v1780_v44 = vpop.f32.mrb[15].mxu0  ;;  %1263 = vrcp.f32 %v732_v32 }
 0x134   : > { %v1782_v45 = vpop.f32.mrb[15].mxu1  ;;  %v1244_v46 = vpop.eup %1243  ;;  %v730_v47 = vadd.f32 1.0, %v1242_v40  ;;  %1265 = vrcp.f32 %v748_v41  ;;  %v1834_v40 = vadd.f32 %v1680_v52, %v589_v59  ;;  %v574_v59 = vmul.f32 %v1774_v37, %v1675_v50 }
 0x135   : > { %v1246_v53 = vpop.eup %1245  ;;  %v746_v56 = vadd.f32 1.0, %v1244_v46  ;;  %v572_v28 = vmul.f32 %v1675_v50, %v1780_v44  ;;  %v1868_v37 = vadd.f32 %v1680_v52, %v587_v13 }
 0x136   : > { %v1248_v48 = vpop.eup %1247  ;;  %1267 = vrcp.f32 %v730_v47  ;;  %v733_v60 = vadd.f32 1.0, %v1246_v53 }
 0x137   : > { %v1250_v2 = vpop.eup %1249  ;;  %v824_v6 = vmul.f32 %v1248_v48, %v1687_v62  ;;  %1269 = vrcp.f32 %v746_v56 }
 0x138   : > { %v1252_v8 = vpop.eup %1251  ;;  %v840_v55 = vmul.f32 %v1250_v2, %v1690_v63  ;;  %1271 = vrcp.f32 %v733_v60  ;;  %v1809_v63 = vadd.f32 %v1680_v52, %v586_v58 }
 0x139   : > { %v1254_v16 = vpop.eup %1253  ;;  %856 = vst [vmem:[%s1804_s8 + $0x10] sm:$0xff] %v824_v6  ;;  %v822_v62 = vmul.f32 %v1252_v8, %v1695_v4  ;;  %1273 = vpow2.f32 %v1079_v25  ;;  %v1067_v25 = vmul.f32 -1.442695, %v1799_v12  ;;  %v571_v8 = vmul.f32 %v1675_v50, %v1766_v27 }
 0x13a   : > { %v1256_v0 = vpop.eup %1255  ;;  %872 = vst [vmem:[%s1804_s8 + $0x90] sm:$0xff] %v840_v55  ;;  %v838_v18 = vmul.f32 %v1254_v16, %v1698_v5  ;;  %1275 = vpow2.f32 %v1061_v33  ;;  %v1083_v33 = vmul.f32 -1.442695, %v1809_v63 }
 0x13b   : > { %v1258_v21 = vpop.eup %1257  ;;  %854 = vst [vmem:[%s1804_s8] sm:$0xff] %v822_v62  ;;  %v825_v4 = vmul.f32 %v1256_v0, %v1705_v10  ;;  %1277 = vpow2.f32 %v1077_v42  ;;  %v1065_v42 = vmul.f32 -1.442695, %v1816_v20 }
 0x13c   : > { %v1260_v24 = vpop.eup %1259  ;;  %870 = vst [vmem:[%s1804_s8 + $0x80] sm:$0xff] %v838_v18  ;;  %v841_v5 = vmul.f32 %v1258_v21, %v1708_v11  ;;  %1279 = vpow2.f32 %v1066_v57 }
 0x13d   : > { %v1262_v32 = vpop.eup %1261  ;;  %857 = vst [vmem:[%s1804_s8 + $0x18] sm:$0xff] %v825_v4  ;;  %v823_v10 = vmul.f32 %v1260_v24, %v1713_v14  ;;  %1281 = vpow2.f32 %v1082_v61  ;;  %v1081_v14 = vmul.f32 -1.442695, %v1822_v22  ;;  %v1863_v4 = vadd.f32 %v1680_v52, %v571_v8 }
 0x13e   : > { %v1264_v41 = vpop.eup %1263  ;;  %873 = vst [vmem:[%s1804_s8 + $0x98] sm:$0xff] %v841_v5  ;;  %v839_v11 = vmul.f32 %v1262_v32, %v1716_v15  ;;  %1283 = vpow2.f32 %v1064_v19  ;;  %v1070_v15 = vmul.f32 -1.442695, %v1828_v29  ;;  %v590_v19 = vmul.f32 %v1776_v38, %v1675_v50 }
 0x13f   : > { %v1266_v43 = vpop.eup %1265  ;;  %855 = vst [vmem:[%s1804_s8 + $0x8] sm:$0xff] %v823_v10  ;;  %v828_v46 = vmul.f32 %v1264_v41, %v1727_v30  ;;  %1285 = vpow2.f32 %v1080_v23  ;;  %v1086_v30 = vmul.f32 -1.442695, %v1834_v40  ;;  %v588_v5 = vmul.f32 %v1675_v50, %v1782_v45 }
 0x140   : > { %v1268_v47 = vpop.eup %1267  ;;  %871 = vst [vmem:[%s1804_s8 + $0x88] sm:$0xff] %v839_v11  ;;  %v844_v51 = vmul.f32 %v1266_v43, %v1730_v31  ;;  %1287 = vpow2.f32 %v1067_v25  ;;  %v1873_v32 = vadd.f32 %v1680_v52, %v574_v59  ;;  %v1876_v44 = vadd.f32 %v1680_v52, %v590_v19 }
 0x141   : > { %v1270_v53 = vpop.eup %1269  ;;  %860 = vst [vmem:[%s1804_s8 + $0x30] sm:$0xff] %v828_v46  ;;  %v826_v56 = vmul.f32 %v1268_v47, %v1734_v35  ;;  %1289 = vpow2.f32 %v1083_v33  ;;  %v1880_v50 = vadd.f32 %v1680_v52, %v572_v28  ;;  %v1084_v46 = vmul.f32 -1.442695, %v1868_v37 }
 0x142   : > { %v1272_v57 = vpop.eup %1271  ;;  %876 = vst [vmem:[%s1804_s8 + $0xb0] sm:$0xff] %v844_v51  ;;  %v842_v58 = vmul.f32 %v1270_v53, %v1737_v36  ;;  %1291 = vpow2.f32 %v1065_v42  ;;  %v1068_v42 = vmul.f32 -1.442695, %v1863_v4 }
 0x143   : > { %v1274_v48 = vpop.eup %1273  ;;  %858 = vst [vmem:[%s1804_s8 + $0x20] sm:$0xff] %v826_v56  ;;  %v829_v31 = vmul.f32 %v1272_v57, %v1742_v39  ;;  %1293 = vpow2.f32 %v1081_v14  ;;  %v1884_v14 = vadd.f32 %v1680_v52, %v588_v5  ;;  %v1069_v52 = vmul.f32 -1.442695, %v1880_v50 }
 0x144   : > { %v1276_v60 = vpop.eup %1275  ;;  %874 = vst [vmem:[%s1804_s8 + $0xa0] sm:$0xff] %v842_v58  ;;  %v749_v61 = vadd.f32 1.0, %v1274_v48  ;;  %1295 = vpow2.f32 %v1070_v15  ;;  %v1071_v15 = vmul.f32 -1.442695, %v1873_v32 }
 0x145   : > { %v1278_v1 = vpop.eup %1277  ;;  %861 = vst [vmem:[%s1804_s8 + $0x38] sm:$0xff] %v829_v31  ;;  %v731_v35 = vadd.f32 1.0, %v1276_v60  ;;  %1297 = vpow2.f32 %v1086_v30  ;;  %v1087_v30 = vmul.f32 -1.442695, %v1876_v44 }
 0x146   : > { %v1280_v2 = vpop.eup %1279  ;;  %1299 = vrcp.f32 %v749_v61  ;;  %v747_v6 = vadd.f32 1.0, %v1278_v1 }
 0x147   : > { %v1282_v7 = vpop.eup %1281  ;;  %1301 = vrcp.f32 %v731_v35  ;;  %v736_v36 = vadd.f32 1.0, %v1280_v2 }
 0x148   : > { %v1284_v55 = vpop.eup %1283  ;;  %1303 = vrcp.f32 %v747_v6  ;;  %v752_v39 = vadd.f32 1.0, %v1282_v7 }
 0x149   : > { %v1286_v16 = vpop.eup %1285  ;;  %1305 = vrcp.f32 %v736_v36  ;;  %v734_v62 = vadd.f32 1.0, %v1284_v55 }
 0x14a   : > { %v1288_v0 = vpop.eup %1287  ;;  %1307 = vrcp.f32 %v752_v39  ;;  %v750_v18 = vadd.f32 1.0, %v1286_v16 }
 0x14b   : > { %v1290_v21 = vpop.eup %1289  ;;  %1309 = vrcp.f32 %v734_v62  ;;  %v737_v27 = vadd.f32 1.0, %v1288_v0 }
 0x14c   : > { %v1292_v23 = vpop.eup %1291  ;;  %1311 = vrcp.f32 %v750_v18  ;;  %v753_v24 = vadd.f32 1.0, %v1290_v21 }
 0x14d   : > { %v1294_v25 = vpop.eup %1293  ;;  %1313 = vrcp.f32 %v737_v27  ;;  %v735_v38 = vadd.f32 1.0, %v1292_v23 }
 0x14e   : > { %v1296_v10 = vpop.eup %1295  ;;  %1315 = vrcp.f32 %v753_v24  ;;  %v751_v33 = vadd.f32 1.0, %v1294_v25 }
 0x14f   : > { %v1298_v41 = vpop.eup %1297  ;;  %1317 = vrcp.f32 %v735_v38  ;;  %v740_v11 = vadd.f32 1.0, %v1296_v10 }
 0x150   : > { %v1300_v45 = vpop.eup %1299  ;;  %1319 = vrcp.f32 %v751_v33  ;;  %v756_v43 = vadd.f32 1.0, %v1298_v41 }
 0x151   : > { %v1302_v47 = vpop.eup %1301  ;;  %v845_v51 = vmul.f32 %v1300_v45, %v1751_v3  ;;  %1321 = vrcp.f32 %v740_v11 }
 0x152   : > { %v1304_v53 = vpop.eup %1303  ;;  %v827_v56 = vmul.f32 %v1302_v47, %v1755_v9  ;;  %1323 = vrcp.f32 %v756_v43  ;;  %v1085_v9 = vmul.f32 -1.442695, %v1884_v14 }
 0x153   : > { %v1306_v57 = vpop.eup %1305  ;;  %877 = vst [vmem:[%s1804_s8 + $0xb8] sm:$0xff] %v845_v51  ;;  %v843_v58 = vmul.f32 %v1304_v53, %v1759_v17  ;;  %1325 = vpow2.f32 %v1068_v42 }
 0x154   : > { %v1308_v3 = vpop.eup %1307  ;;  %859 = vst [vmem:[%s1804_s8 + $0x28] sm:$0xff] %v827_v56  ;;  %v832_v48 = vmul.f32 %v1306_v57, %v1764_v26  ;;  %1327 = vpow2.f32 %v1084_v46 }
 0x155   : > { %v1310_v31 = vpop.eup %1309  ;;  %875 = vst [vmem:[%s1804_s8 + $0xa8] sm:$0xff] %v843_v58  ;;  %v848_v60 = vmul.f32 %v1308_v3, %v1772_v34  ;;  %1329 = vpow2.f32 %v1071_v15 }
 0x156   : > { %v1312_v61 = vpop.eup %1311  ;;  %864 = vst [vmem:[%s1804_s8 + $0x50] sm:$0xff] %v832_v48  ;;  %v830_v17 = vmul.f32 %v1310_v31, %v1785_v49  ;;  %1331 = vpow2.f32 %v1087_v30 }
 0x157   : > { %v1314_v1 = vpop.eup %1313  ;;  %880 = vst [vmem:[%s1804_s8 + $0xd0] sm:$0xff] %v848_v60  ;;  %v846_v26 = vmul.f32 %v1312_v61, %v1794_v54  ;;  %1333 = vpow2.f32 %v1069_v52 }
 0x158   : > { %v1316_v35 = vpop.eup %1315  ;;  %862 = vst [vmem:[%s1804_s8 + $0x40] sm:$0xff] %v830_v17  ;;  %v833_v2 = vmul.f32 %v1314_v1, %v1799_v12  ;;  %1335 = vpow2.f32 %v1085_v9 }
 0x159   : > { %v1318_v34 = vpop.eup %1317  ;;  %878 = vst [vmem:[%s1804_s8 + $0xc0] sm:$0xff] %v846_v26  ;;  %v849_v6 = vmul.f32 %v1316_v35, %v1809_v63 }
 0x15a   : > { %v1320_v49 = vpop.eup %1319  ;;  %865 = vst [vmem:[%s1804_s8 + $0x58] sm:$0xff] %v833_v2  ;;  %v831_v7 = vmul.f32 %v1318_v34, %v1816_v20 }
 0x15b   : > { %v1322_v36 = vpop.eup %1321  ;;  %881 = vst [vmem:[%s1804_s8 + $0xd8] sm:$0xff] %v849_v6  ;;  %v847_v54 = vmul.f32 %v1320_v49, %v1822_v22 }
 0x15c   : > { %v1324_v8 = vpop.eup %1323  ;;  %863 = vst [vmem:[%s1804_s8 + $0x48] sm:$0xff] %v831_v7  ;;  %v836_v55 = vmul.f32 %v1322_v36, %v1828_v29 }
 0x15d   : > { %v1326_v12 = vpop.eup %1325  ;;  %879 = vst [vmem:[%s1804_s8 + $0xc8] sm:$0xff] %v847_v54  ;;  %v852_v39 = vmul.f32 %v1324_v8, %v1834_v40 }
 0x15e   : > { %v1328_v13 = vpop.eup %1327  ;;  %868 = vst [vmem:[%s1804_s8 + $0x70] sm:$0xff] %v836_v55  ;;  %v738_v63 = vadd.f32 1.0, %v1326_v12 }
 0x15f   : > { %v1330_v16 = vpop.eup %1329  ;;  %884 = vst [vmem:[%s1804_s8 + $0xf0] sm:$0xff] %v852_v39  ;;  %v754_v62 = vadd.f32 1.0, %v1328_v13 }
 0x160   : > { %v1332_v59 = vpop.eup %1331  ;;  %1337 = vrcp.f32 %v738_v63  ;;  %v741_v20 = vadd.f32 1.0, %v1330_v16 }
 0x161   : > { %v1334_v0 = vpop.eup %1333  ;;  %1339 = vrcp.f32 %v754_v62  ;;  %v757_v22 = vadd.f32 1.0, %v1332_v59 }
 0x162   : > { %v1336_v29 = vpop.eup %1335  ;;  %1341 = vrcp.f32 %v741_v20  ;;  %v739_v18 = vadd.f32 1.0, %v1334_v0 }
 0x163   : > { %1343 = vrcp.f32 %v757_v22  ;;  %v755_v40 = vadd.f32 1.0, %v1336_v29 }
 0x164   : > { %1345 = vrcp.f32 %v739_v18 }
 0x165   : > { %1347 = vrcp.f32 %v755_v40 }
 0x16a   : > { %v1338_v19 = vpop.eup %1337 }
 0x16b   : > { %v1340_v21 = vpop.eup %1339  ;;  %v834_v27 = vmul.f32 %v1338_v19, %v1863_v4 }
 0x16c   : > { %v1342_v28 = vpop.eup %1341  ;;  %v850_v23 = vmul.f32 %v1340_v21, %v1868_v37 }
 0x16d   : > { %v1344_v24 = vpop.eup %1343  ;;  %866 = vst [vmem:[%s1804_s8 + $0x60] sm:$0xff] %v834_v27  ;;  %v837_v5 = vmul.f32 %v1342_v28, %v1873_v32 }
 0x16e   : > { %v1346_v25 = vpop.eup %1345  ;;  %882 = vst [vmem:[%s1804_s8 + $0xe0] sm:$0xff] %v850_v23  ;;  %v853_v38 = vmul.f32 %v1344_v24, %v1876_v44 }
 0x16f   : > { %v1348_v10 = vpop.eup %1347  ;;  %869 = vst [vmem:[%s1804_s8 + $0x78] sm:$0xff] %v837_v5  ;;  %v835_v4 = vmul.f32 %v1346_v25, %v1880_v50 }
 0x170   : > { %885 = vst [vmem:[%s1804_s8 + $0xf8] sm:$0xff] %v853_v38  ;;  %v851_v37 = vmul.f32 %v1348_v10, %v1884_v14 }
 0x171   : > { %867 = vst [vmem:[%s1804_s8 + $0x68] sm:$0xff] %v835_v4 }
 0x172   : > { %883 = vst [vmem:[%s1804_s8 + $0xe8] sm:$0xff] %v851_v37 }
 0x173   : > { %1392 = shalt.err (!%p1389_p5)
}
 0x174   : > { %s1393_s14 = scalar_lea.hbm %s1929_s18, 4096  ;;  %s1397_s5 = scalar_lea.hbm %s1988_s4, 8192 }
 0x175   : > { %p1394_p4 = scmp.ne.s32.totalorder %s1929_s18, %s1393_s14  ;;  %p1398_p12 = scmp.lt.u32.totalorder %s1929_s18, %s1988_s4 }
 0x176   : > { %p1399_p1 = scmp.lt.u32.totalorder %s1397_s5, %s1393_s14  ;;  %p1401_p8 = scmp.lt.u32.totalorder %s1393_s14, %s1929_s18 }
 0x177   : > { %p1395_p7 = pnand %p1394_p4, %p1996_p9 }
 0x178   : > { %p1400_p3 = por %p1399_p1, %p1398_p12 }
 0x179   : > { %p1396_p10 = pneg %p1395_p7 }
 0x17a   : > { %p1402_p11 = por %p1401_p8, %p1400_p3 }
 0x17c   : > { %p1403_p0 = pnand %p1402_p11, %p1396_p10 }
 0x17e   : > { %1406 = shalt.err (!%p1403_p0)
}
 0x17f   : > { %s1467_s9 = smov 128   ;;  %s1468_s21 = smov 8  }
 0x180   : > { %1155 = dma.vmem_to_hbm [thread:$0]  (%p1996_p9), %s1931_s11, 4096, %s1929_s18, %s887_s25, %s1467_s9, %s1467_s9, %s1468_s21  }
 0x181 PF: > { %s916_s24 = sand.u32 1, %s1441_s15   ;;  %p1997_p6 = scmp.ne.s32.totalorder %s1993_s30, 0 }
 0x182   : > { %p1998_p13 = scmp.ge.s32.totalorder %s1461_s20, 2  ;;  %s917_s26 = scalar_lea.sflag [#allocation4], %s916_s24 }
 0x184   : > { %p1162_p2 = pnand %p1998_p13, %p1997_p6 }
 0x186   : > { %1436 = dma.done.wait (!%p1162_p2), %s917_s26, 4096  }
 0x187   : > { %1438 = vsyncadd (!%p1162_p2), %s917_s26, 4294963200  ;;  %s20_s20 = sadd.s32 1, %s1461_s20   ;;  %s1999_s15 = smov %s1445_s16 }
 0x188   : > { %p17_p5 = scmp.ge.s32.totalorder %s20_s20, 4   ;;  %s2000_s16 = smov %s1449_s17 }
 0x189   : > { %s2001_s17 = smov %s1550_s29  ;;  %s2002_s18 = smov %s1457_s19 }
 0x18a   : > { %s2003_s19 = smov %s2005_s23  ;;  %19 = sbr.rel (!%p17_p5) target bundleno = 6 (0x6), region = 90 }
 0x191   :  { %922 = vsyncpa [#allocation3], 1 }
 0x192   :  { %924 = vsyncpa [#allocation3 + $0x1], 1 }
 0x193   :  { %925 = vsyncpa [#allocation4], 1 }
 0x194   :  { %927 = vsyncpa [#allocation4 + $0x1], 1 }

</bundles_post_ra>
